<compile_context>
chip_gen: v6e
topology: v6e:2x2x1
jax: 0.10.0
libtpu: 0.0.40
codegen_flags: <defaults>
</compile_context>

<pallas_src>
import functools

import jax
import jax.numpy as jnp
from jax.experimental import pallas as pl
from jax.experimental.pallas import tpu as pltpu


def _round_up(x: int, m: int) -> int:
    return ((x + m - 1) // m) * m


def _mlp_kernel(*refs, num_layers: int):
    """Fused MLP: refs = (x, w0, b0, w1, b1, ..., w{L-1}, b{L-1}, out).

    x / w_l are bf16, b_l / out are f32.  The layer loop is a Python unroll;
    the running activation `h`/`y` stays on-chip (never written to HBM).
    """
    x_ref = refs[0]
    o_ref = refs[-1]
    wb_refs = refs[1:-1]

    h = x_ref[...]                                  # (TB, F0_pad) bf16
    y = None
    for l in range(num_layers):
        w_ref = wb_refs[2 * l]
        b_ref = wb_refs[2 * l + 1]
        # MXU matmul with f32 accumulation.
        y = jnp.dot(h, w_ref[...], preferred_element_type=jnp.float32)
        # bias add + relu in f32 (VPU), single fused expression.
        y = jnp.maximum(y + b_ref[...], 0.0)
        if l < num_layers - 1:
            h = y.astype(x_ref.dtype)               # back to bf16 for next MXU op
    o_ref[...] = y.astype(o_ref.dtype)


def init_network_params(key, in_dim, out_dim, num_layers, mid_features=128,
                        dtype=jnp.float32):
    """Deterministic params matching Network.__init__ shapes.

    Weights are stored [in_features, out_features] (transposed from torch's
    [out, in]) so the kernel computes y = relu(x @ W + b).  Mirrors
    nn.Linear's uniform(-1/sqrt(fan_in), 1/sqrt(fan_in)) init.
    """
    dims = [in_dim] + [mid_features] * (num_layers - 1) + [out_dim]
    params = []
    for i in range(num_layers):
        fan_in, fan_out = dims[i], dims[i + 1]
        key, kw, kb = jax.random.split(key, 3)
        bound = 1.0 / (fan_in ** 0.5)
        w = jax.random.uniform(kw, (fan_in, fan_out), dtype=dtype,
                               minval=-bound, maxval=bound)
        b = jax.random.uniform(kb, (fan_out,), dtype=dtype,
                               minval=-bound, maxval=bound)
        params.append((w, b))
    return params


def network_forward(x, params, *, compute_dtype=jnp.bfloat16, tile_b=128):
    """Network.forward as one fused Pallas call.

    Pads feature dims to multiples of 128 (lane-dense), pads batch to the
    batch-tile, runs the fused kernel, slices the padding back off.
    """
    B, in_dim = x.shape
    num_layers = len(params)
    out_dim = params[-1][0].shape[1]

    # Padded (lane-dense) feature dims per layer boundary.
    dims = [in_dim] + [w.shape[1] for (w, _) in params]
    pdims = [_round_up(d, 128) for d in dims]

    # Batch tile: multiple of 16 (bf16 sublane packing), capped at tile_b.
    TB = min(tile_b, _round_up(B, 16))
    B_pad = _round_up(B, TB)

    # Zero-pad activation input and parameters.  Zero pad rows/cols contribute
    # exactly zero through every layer, so the valid slice is unchanged.
    x_p = jnp.zeros((B_pad, pdims[0]), compute_dtype)
    x_p = x_p.at[:B, :in_dim].set(x.astype(compute_dtype))

    flat_params = []
    in_specs = [pl.BlockSpec((TB, pdims[0]), lambda i: (i, 0))]
    for l, (w, b) in enumerate(params):
        fi, fo = w.shape
        w_p = jnp.zeros((pdims[l], pdims[l + 1]), compute_dtype)
        w_p = w_p.at[:fi, :fo].set(w.astype(compute_dtype))
        b_p = jnp.zeros((1, pdims[l + 1]), jnp.float32)
        b_p = b_p.at[0, :fo].set(b.astype(jnp.float32))
        flat_params += [w_p, b_p]
        # Constant index_map -> weights/biases stay resident in VMEM across
        # all batch tiles (DMA'd once per call).
        in_specs.append(pl.BlockSpec((pdims[l], pdims[l + 1]), lambda i: (0, 0)))
        in_specs.append(pl.BlockSpec((1, pdims[l + 1]), lambda i: (0, 0)))

    out_specs = pl.BlockSpec((TB, pdims[-1]), lambda i: (i, 0))
    kernel = functools.partial(_mlp_kernel, num_layers=num_layers)

    out_p = pl.pallas_call(
        kernel,
        out_shape=jax.ShapeDtypeStruct((B_pad, pdims[-1]), jnp.float32),
        grid_spec=pltpu.PrefetchScalarGridSpec(
            num_scalar_prefetch=0,
            grid=(B_pad // TB,),
            in_specs=in_specs,
            out_specs=out_specs,
        ),
        compiler_params=pltpu.CompilerParams(
            dimension_semantics=("parallel",)),
    )(x_p, *flat_params)

    return out_p[:B, :out_dim]


def network_forward_ref(x, params, *, compute_dtype=jnp.bfloat16):
    """Pure-JAX reference following the same bf16-operand / f32-accumulate path."""
    h = x.astype(compute_dtype)
    y = None
    for (w, b) in params:
        y = jnp.dot(h, w.astype(compute_dtype),
                    preferred_element_type=jnp.float32)
        y = jnp.maximum(y + b.astype(jnp.float32), 0.0)
        h = y.astype(compute_dtype)
    return y


if __name__ == "__main__":
    # Small shapes consistent with the module: Network(in_dim=32, out_dim=16,
    # num_layers=4, mid_features=128), batch of 8 feature vectors.
    batch, in_dim, out_dim, num_layers, mid = 8, 32, 16, 4, 128

    key = jax.random.PRNGKey(0)
    key, kx = jax.random.split(key)
    x = jax.random.normal(kx, (batch, in_dim), dtype=jnp.float32)
    params = init_network_params(key, in_dim, out_dim, num_layers, mid)

    out = network_forward(x, params)
    out = jax.block_until_ready(out)

    ref = network_forward_ref(x, params)
    assert out.shape == (batch, out_dim)
    assert jnp.allclose(out, ref, atol=1e-3, rtol=1e-3), "mismatch vs reference"

    print("KERNEL_OK")
</pallas_src>

<mosaic_0001>
module attributes {stable_mosaic.version = 11 : i64} {
  func.func @_mlp_kernel(%arg0: i32, %arg1: memref<16x128xbf16, #tpu.memory_space<vmem>>, %arg2: memref<128x128xbf16, #tpu.memory_space<vmem>>, %arg3: memref<1x128xf32, #tpu.memory_space<vmem>>, %arg4: memref<128x128xbf16, #tpu.memory_space<vmem>>, %arg5: memref<1x128xf32, #tpu.memory_space<vmem>>, %arg6: memref<128x128xbf16, #tpu.memory_space<vmem>>, %arg7: memref<1x128xf32, #tpu.memory_space<vmem>>, %arg8: memref<128x128xbf16, #tpu.memory_space<vmem>>, %arg9: memref<1x128xf32, #tpu.memory_space<vmem>>, %arg10: memref<16x128xf32, #tpu.memory_space<vmem>>) attributes {dimension_semantics = [#tpu.dimension_semantics<parallel>], iteration_bounds = array<i64: 1>, scalar_prefetch = 0 : i64, scratch_operands = 0 : i64, tpu.core_type = #tpu.core_type<tc>, window_params = [{transform_indices = @transform_0, window_bounds = array<i64: 16, 128>}, {pipeline_mode = #tpu.pipeline_mode<synchronous>, transform_indices = @transform_1, window_bounds = array<i64: 128, 128>}, {pipeline_mode = #tpu.pipeline_mode<synchronous>, transform_indices = @transform_2, window_bounds = array<i64: 1, 128>}, {pipeline_mode = #tpu.pipeline_mode<synchronous>, transform_indices = @transform_3, window_bounds = array<i64: 128, 128>}, {pipeline_mode = #tpu.pipeline_mode<synchronous>, transform_indices = @transform_4, window_bounds = array<i64: 1, 128>}, {pipeline_mode = #tpu.pipeline_mode<synchronous>, transform_indices = @transform_5, window_bounds = array<i64: 128, 128>}, {pipeline_mode = #tpu.pipeline_mode<synchronous>, transform_indices = @transform_6, window_bounds = array<i64: 1, 128>}, {pipeline_mode = #tpu.pipeline_mode<synchronous>, transform_indices = @transform_7, window_bounds = array<i64: 128, 128>}, {pipeline_mode = #tpu.pipeline_mode<synchronous>, transform_indices = @transform_8, window_bounds = array<i64: 1, 128>}, {transform_indices = @transform_9, window_bounds = array<i64: 16, 128>}]} {
    %c0 = arith.constant 0 : index
    %c0_0 = arith.constant 0 : index
    %0 = vector.load %arg1[%c0, %c0_0] : memref<16x128xbf16, #tpu.memory_space<vmem>>, vector<16x128xbf16>
    %c0_1 = arith.constant 0 : index
    %c0_2 = arith.constant 0 : index
    %1 = vector.load %arg2[%c0_1, %c0_2] : memref<128x128xbf16, #tpu.memory_space<vmem>>, vector<128x128xbf16>
    %cst = arith.constant dense<0.000000e+00> : vector<16x128xf32>
    %2 = tpu.matmul %0, %1, %cst {dimension_numbers = #tpu.dot_dimension_numbers<[1], [0], [0], [1], [0, 0, 1, 1], [], []>} : vector<16x128xbf16>, vector<128x128xbf16>, vector<16x128xf32> -> vector<16x128xf32>
    %c0_3 = arith.constant 0 : index
    %c0_4 = arith.constant 0 : index
    %3 = vector.load %arg3[%c0_3, %c0_4] : memref<1x128xf32, #tpu.memory_space<vmem>>, vector<1x128xf32>
    %4 = vector.broadcast %3 : vector<1x128xf32> to vector<16x128xf32>
    %5 = arith.addf %2, %4 : vector<16x128xf32>
    %cst_5 = arith.constant 0.000000e+00 : f32
    %6 = vector.broadcast %cst_5 : f32 to vector<16x128xf32>
    %7 = arith.maximumf %5, %6 : vector<16x128xf32>
    %8 = arith.truncf %7 : vector<16x128xf32> to vector<16x128xbf16>
    %c0_6 = arith.constant 0 : index
    %c0_7 = arith.constant 0 : index
    %9 = vector.load %arg4[%c0_6, %c0_7] : memref<128x128xbf16, #tpu.memory_space<vmem>>, vector<128x128xbf16>
    %cst_8 = arith.constant dense<0.000000e+00> : vector<16x128xf32>
    %10 = tpu.matmul %8, %9, %cst_8 {dimension_numbers = #tpu.dot_dimension_numbers<[1], [0], [0], [1], [0, 0, 1, 1], [], []>} : vector<16x128xbf16>, vector<128x128xbf16>, vector<16x128xf32> -> vector<16x128xf32>
    %c0_9 = arith.constant 0 : index
    %c0_10 = arith.constant 0 : index
    %11 = vector.load %arg5[%c0_9, %c0_10] : memref<1x128xf32, #tpu.memory_space<vmem>>, vector<1x128xf32>
    %12 = vector.broadcast %11 : vector<1x128xf32> to vector<16x128xf32>
    %13 = arith.addf %10, %12 : vector<16x128xf32>
    %cst_11 = arith.constant 0.000000e+00 : f32
    %14 = vector.broadcast %cst_11 : f32 to vector<16x128xf32>
    %15 = arith.maximumf %13, %14 : vector<16x128xf32>
    %16 = arith.truncf %15 : vector<16x128xf32> to vector<16x128xbf16>
    %c0_12 = arith.constant 0 : index
    %c0_13 = arith.constant 0 : index
    %17 = vector.load %arg6[%c0_12, %c0_13] : memref<128x128xbf16, #tpu.memory_space<vmem>>, vector<128x128xbf16>
    %cst_14 = arith.constant dense<0.000000e+00> : vector<16x128xf32>
    %18 = tpu.matmul %16, %17, %cst_14 {dimension_numbers = #tpu.dot_dimension_numbers<[1], [0], [0], [1], [0, 0, 1, 1], [], []>} : vector<16x128xbf16>, vector<128x128xbf16>, vector<16x128xf32> -> vector<16x128xf32>
    %c0_15 = arith.constant 0 : index
    %c0_16 = arith.constant 0 : index
    %19 = vector.load %arg7[%c0_15, %c0_16] : memref<1x128xf32, #tpu.memory_space<vmem>>, vector<1x128xf32>
    %20 = vector.broadcast %19 : vector<1x128xf32> to vector<16x128xf32>
    %21 = arith.addf %18, %20 : vector<16x128xf32>
    %cst_17 = arith.constant 0.000000e+00 : f32
    %22 = vector.broadcast %cst_17 : f32 to vector<16x128xf32>
    %23 = arith.maximumf %21, %22 : vector<16x128xf32>
    %24 = arith.truncf %23 : vector<16x128xf32> to vector<16x128xbf16>
    %c0_18 = arith.constant 0 : index
    %c0_19 = arith.constant 0 : index
    %25 = vector.load %arg8[%c0_18, %c0_19] : memref<128x128xbf16, #tpu.memory_space<vmem>>, vector<128x128xbf16>
    %cst_20 = arith.constant dense<0.000000e+00> : vector<16x128xf32>
    %26 = tpu.matmul %24, %25, %cst_20 {dimension_numbers = #tpu.dot_dimension_numbers<[1], [0], [0], [1], [0, 0, 1, 1], [], []>} : vector<16x128xbf16>, vector<128x128xbf16>, vector<16x128xf32> -> vector<16x128xf32>
    %c0_21 = arith.constant 0 : index
    %c0_22 = arith.constant 0 : index
    %27 = vector.load %arg9[%c0_21, %c0_22] : memref<1x128xf32, #tpu.memory_space<vmem>>, vector<1x128xf32>
    %28 = vector.broadcast %27 : vector<1x128xf32> to vector<16x128xf32>
    %29 = arith.addf %26, %28 : vector<16x128xf32>
    %cst_23 = arith.constant 0.000000e+00 : f32
    %30 = vector.broadcast %cst_23 : f32 to vector<16x128xf32>
    %31 = arith.maximumf %29, %30 : vector<16x128xf32>
    %c0_24 = arith.constant 0 : index
    %c0_25 = arith.constant 0 : index
    %32 = vector.load %arg10[%c0_24, %c0_25] : memref<16x128xf32, #tpu.memory_space<vmem>>, vector<16x128xf32>
    tpu.vector_store %arg10[%c0_24, %c0_25], %31 {strides = array<i32>} : memref<16x128xf32, #tpu.memory_space<vmem>>, vector<16x128xf32>,
    return
  }
  func.func @transform_0(%arg0: i32) -> (i32, i32) {
    %c0_i32 = arith.constant 0 : i32
    %c0_i32_0 = arith.constant 0 : i32
    return %arg0, %c0_i32 : i32, i32
  }
  func.func @transform_1(%arg0: i32) -> (i32, i32) {
    %c0_i32 = arith.constant 0 : i32
    %c0_i32_0 = arith.constant 0 : i32
    %c0_i32_1 = arith.constant 0 : i32
    return %c0_i32, %c0_i32_0 : i32, i32
  }
  func.func @transform_2(%arg0: i32) -> (i32, i32) {
    %c0_i32 = arith.constant 0 : i32
    %c0_i32_0 = arith.constant 0 : i32
    %c0_i32_1 = arith.constant 0 : i32
    return %c0_i32, %c0_i32_0 : i32, i32
  }
  func.func @transform_3(%arg0: i32) -> (i32, i32) {
    %c0_i32 = arith.constant 0 : i32
    %c0_i32_0 = arith.constant 0 : i32
    %c0_i32_1 = arith.constant 0 : i32
    return %c0_i32, %c0_i32_0 : i32, i32
  }
  func.func @transform_4(%arg0: i32) -> (i32, i32) {
    %c0_i32 = arith.constant 0 : i32
    %c0_i32_0 = arith.constant 0 : i32
    %c0_i32_1 = arith.constant 0 : i32
    return %c0_i32, %c0_i32_0 : i32, i32
  }
  func.func @transform_5(%arg0: i32) -> (i32, i32) {
    %c0_i32 = arith.constant 0 : i32
    %c0_i32_0 = arith.constant 0 : i32
    %c0_i32_1 = arith.constant 0 : i32
    return %c0_i32, %c0_i32_0 : i32, i32
  }
  func.func @transform_6(%arg0: i32) -> (i32, i32) {
    %c0_i32 = arith.constant 0 : i32
    %c0_i32_0 = arith.constant 0 : i32
    %c0_i32_1 = arith.constant 0 : i32
    return %c0_i32, %c0_i32_0 : i32, i32
  }
  func.func @transform_7(%arg0: i32) -> (i32, i32) {
    %c0_i32 = arith.constant 0 : i32
    %c0_i32_0 = arith.constant 0 : i32
    %c0_i32_1 = arith.constant 0 : i32
    return %c0_i32, %c0_i32_0 : i32, i32
  }
  func.func @transform_8(%arg0: i32) -> (i32, i32) {
    %c0_i32 = arith.constant 0 : i32
    %c0_i32_0 = arith.constant 0 : i32
    %c0_i32_1 = arith.constant 0 : i32
    return %c0_i32, %c0_i32_0 : i32, i32
  }
  func.func @transform_9(%arg0: i32) -> (i32, i32) {
    %c0_i32 = arith.constant 0 : i32
    %c0_i32_0 = arith.constant 0 : i32
    return %arg0, %c0_i32 : i32, i32
  }
}

</mosaic_0001>

<bundles_post_ra>
// kernel: tpu_custom_call.1
= control target key start
LH: loop header
LB: loop body
LE: loop exit
PB: predicated region body
PF: predicated region fallthrough
CT: control target
= control target key end

     0   :  { %14 = vsyncpa [#allocation3], 0  ;;  %s1063_s0 = inlined_call_operand.hbm [shape: bf16[16,128], index: 0, kind: input, shape index: {}]   ;;  %s1064_s1 = inlined_call_operand.hbm [shape: bf16[128,128], index: 1, kind: input, shape index: {}]   ;;  %s1065_s2 = inlined_call_operand.vmem [shape: f32[1,128], index: 2, kind: input, shape index: {}]   ;;  %s1066_s3 = inlined_call_operand.hbm [shape: bf16[128,128], index: 3, kind: input, shape index: {}]   ;;  %s1067_s4 = inlined_call_operand.vmem [shape: f32[1,128], index: 4, kind: input, shape index: {}]   ;;  %s1068_s5 = inlined_call_operand.hbm [shape: bf16[128,128], index: 5, kind: input, shape index: {}]   ;;  %s1069_s6 = inlined_call_operand.vmem [shape: f32[1,128], index: 6, kind: input, shape index: {}]   ;;  %s1070_s7 = inlined_call_operand.hbm [shape: bf16[128,128], index: 7, kind: input, shape index: {}]   ;;  %s1071_s8 = inlined_call_operand.vmem [shape: f32[1,128], index: 8, kind: input, shape index: {}]   ;;  %s1072_s9 = inlined_call_operand.hbm [shape: f32[16,128], index: 9, kind: output, shape index: {}]  }
   0x1   :  { %15 = vsyncpa [#allocation6], 0 }
   0x2   :  { %16 = vsyncpa [#allocation9], 0 }
   0x3   :  { %17 = vsyncpa [#allocation4], 0  ;;  %s916_s30 = smov [#allocation5]   ;;  %s917_s11 = smov [#allocation8]  }
   0x4   :  { %s35_s10 = sshll.u32 %s916_s30, 4  ;;  %s63_s12 = sshll.u32 %s917_s11, 4  ;;  %s36_s10 = int_to_ptr.vmem [resolvable:$true] %s35_s10  ;;  %s64_s12 = int_to_ptr.vmem [resolvable:$true] %s63_s12 }
   0x5   :  { %s796_s13 = scalar_lea.vmem %s36_s10, 1024  ;;  %p801_p1 = scmp.lt.s32.totalorder %s36_s10, %s36_s10 }
   0x6   :  { %p797_p0 = scmp.ne.s32.totalorder %s36_s10, %s796_s13  ;;  %p802_p2 = scmp.lt.s32.totalorder %s796_s13, %s796_s13 }
   0x8   :  { %p803_p3 = por %p802_p2, %p801_p1 }
   0xa   :  { %p804_p4 = pnand %p803_p3, %p797_p0 }
   0xc   :  { %807 = shalt.err (!%p804_p4)
}
   0xd   :  { %s918_s14 = smov 64   ;;  %s919_s15 = smov 4  }
   0xe   :  { %41 = dma.hbm_to_vmem [thread:$0]  %s1064_s1, 1024, %s36_s10, [#allocation6], %s918_s14, %s918_s14, %s919_s15  }
   0xf   :  { %s816_s18 = scalar_lea.vmem %s64_s12, 1024  ;;  %p821_p6 = scmp.lt.s32.totalorder %s64_s12, %s64_s12 }
  0x10   :  { %p817_p5 = scmp.ne.s32.totalorder %s64_s12, %s816_s18  ;;  %p822_p7 = scmp.lt.s32.totalorder %s816_s18, %s816_s18 }
  0x12   :  { %p823_p8 = por %p822_p7, %p821_p6 }
  0x14   :  { %p824_p9 = pnand %p823_p8, %p817_p5 }
  0x16   :  { %827 = shalt.err (!%p824_p9)
}
  0x17   :  { %69 = dma.hbm_to_vmem [thread:$0]  %s1068_s5, 1024, %s64_s12, [#allocation9], %s918_s14, %s918_s14, %s919_s15  }
  0x18   :  { %s920_s21 = smov [#allocation2]   ;;  %s921_s23 = smov [#allocation7]  }
  0x19   :  { %s23_s22 = sshll.u32 %s920_s21, 4  ;;  %s49_s24 = sshll.u32 %s921_s23, 4  ;;  %s24_s22 = int_to_ptr.vmem [resolvable:$true] %s23_s22  ;;  %s50_s24 = int_to_ptr.vmem [resolvable:$true] %s49_s24 }
  0x1a   :  { %s836_s1 = scalar_lea.vmem %s24_s22, 128  ;;  %p841_p11 = scmp.lt.s32.totalorder %s24_s22, %s24_s22 }
  0x1b   :  { %p837_p10 = scmp.ne.s32.totalorder %s24_s22, %s836_s1  ;;  %p842_p12 = scmp.lt.s32.totalorder %s836_s1, %s836_s1 }
  0x1d   :  { %p843_p13 = por %p842_p12, %p841_p11 }
  0x1f   :  { %p844_p0 = pnand %p843_p13, %p837_p10 }
  0x21   :  { %847 = shalt.err (!%p844_p0)
}
  0x22   :  { %29 = dma.hbm_to_vmem [thread:$0]  %s1063_s0, 128, %s24_s22, [#allocation3], %s918_s14, %s918_s14, %s919_s15  }
  0x23   :  { %s856_s5 = scalar_lea.vmem %s50_s24, 1024  ;;  %p861_p2 = scmp.lt.s32.totalorder %s50_s24, %s50_s24 }
  0x24   :  { %p857_p1 = scmp.ne.s32.totalorder %s50_s24, %s856_s5  ;;  %p862_p3 = scmp.lt.s32.totalorder %s856_s5, %s856_s5 }
  0x26   :  { %p863_p4 = por %p862_p3, %p861_p2 }
  0x28   :  { %p864_p5 = pnand %p863_p4, %p857_p1 }
  0x2a   :  { %867 = shalt.err (!%p864_p5)
}
  0x2b   :  { %55 = dma.hbm_to_vmem [thread:$0]  %s1066_s3, 1024, %s50_s24, [#allocation6], %s918_s14, %s918_s14, %s919_s15  }
  0x2c   :  { %s922_s29 = smov [#allocation10]  }
  0x2d   :  { %s77_s30 = sshll.u32 %s922_s29, 4  ;;  %s78_s30 = int_to_ptr.vmem [resolvable:$true] %s77_s30 }
  0x2e   :  { %s876_s10 = scalar_lea.vmem %s78_s30, 1024  ;;  %p881_p7 = scmp.lt.s32.totalorder %s78_s30, %s78_s30 }
  0x2f   :  { %p877_p6 = scmp.ne.s32.totalorder %s78_s30, %s876_s10  ;;  %p882_p8 = scmp.lt.s32.totalorder %s876_s10, %s876_s10 }
  0x31   :  { %p883_p9 = por %p882_p8, %p881_p7 }
  0x33   :  { %p884_p10 = pnand %p883_p9, %p877_p6 }
  0x35   :  { %887 = shalt.err (!%p884_p10)
}
  0x36   :  { %83 = dma.hbm_to_vmem [thread:$0]  %s1070_s7, 1024, %s78_s30, [#allocation9], %s918_s14, %s918_s14, %s919_s15  }
  0x37   :  { %908 = dma.done.wait [#allocation3], 128  }
  0x38   :  { %909 = vsyncadd [#allocation3], 4294967168 }
  0x39   :  { %910 = dma.done.wait [#allocation6], 2048  }
  0x3a   :  { %911 = vsyncadd [#allocation6], 4294965248 }
  0x3b   :  { %912 = dma.done.wait [#allocation9], 2048  }
  0x3c   :  { %913 = vsyncadd [#allocation9], 4294965248  ;;  %v923_v0 = vmov 0.0   ;;  %vm924_vm0 = vmmov 0   ;;  %v755_v1 = vld [vmem:[#allocation5 + $0x38] sm:$0xff]   ;;  %v756_v2 = vld [vmem:[#allocation5 + $0x30] sm:$0xff]  }
  0x3d   :  { %663 = vmatprep.subr.bf16.mxu0 %v923_v0  ;;  %679 = vmatprep.mubr.msk.bf16.mxu0 %vm924_vm0, %v923_v0  ;;  %v757_v3 = vld [vmem:[#allocation5 + $0x28] sm:$0xff]   ;;  %v764_v4 = vld [vmem:[#allocation7 + $0x38] sm:$0xff]   ;;  %v758_v5 = vld [vmem:[#allocation5 + $0x20] sm:$0xff]   ;;  %s925_s16 = smov [#allocation11]  }
  0x3e   :  { %683 = vmatprep.subr.bf16.mxu1 %v923_v0  ;;  %699 = vmatprep.mubr.msk.bf16.mxu1 %vm924_vm0, %v923_v0  ;;  %v765_v6 = vld [vmem:[#allocation7 + $0x30] sm:$0xff]   ;;  %v759_v7 = vld [vmem:[#allocation5 + $0x18] sm:$0xff]   ;;  %v766_v8 = vld [vmem:[#allocation7 + $0x28] sm:$0xff]  }
  0x3f   :  { %664 = vmatpush3.bf16.msra.mxu0 %v755_v1  ;;  %684 = vmatpush3.bf16.msra.mxu1 %v764_v4  ;;  %v760_v9 = vld [vmem:[#allocation5 + $0x10] sm:$0xff]   ;;  %v767_v10 = vld [vmem:[#allocation7 + $0x20] sm:$0xff]   ;;  %v761_v11 = vld [vmem:[#allocation5 + $0x8] sm:$0xff]  }
  0x40   :  { %665 = vmatprep.subr.bf16.mxu0 %v923_v0  ;;  %685 = vmatprep.subr.bf16.mxu1 %v923_v0  ;;  %v768_v12 = vld [vmem:[#allocation7 + $0x18] sm:$0xff]   ;;  %v762_v13 = vld [vmem:[#allocation5] sm:$0xff]   ;;  %v769_v15 = vld [vmem:[#allocation7 + $0x10] sm:$0xff]  }
  0x41   :  { %v763_v14 = vld [vmem:[#allocation2] sm:$0xff]   ;;  %v770_v16 = vld [vmem:[#allocation7 + $0x8] sm:$0xff]   ;;  %v771_v17 = vld [vmem:[#allocation7] sm:$0xff]  }
  0x42   :  { %v772_v18 = vld [vmem:[#allocation8 + $0x38] sm:$0xff]   ;;  %v773_v19 = vld [vmem:[#allocation8 + $0x30] sm:$0xff]   ;;  %v774_v20 = vld [vmem:[#allocation8 + $0x28] sm:$0xff]  }
  0x43   :  { %666 = vmatpush3.bf16.msra.mxu0 %v756_v2  ;;  %686 = vmatpush3.bf16.msra.mxu1 %v765_v6  ;;  %v775_v21 = vld [vmem:[#allocation8 + $0x20] sm:$0xff]   ;;  %v776_v22 = vld [vmem:[#allocation8 + $0x18] sm:$0xff]   ;;  %v777_v33 = vld [vmem:[#allocation8 + $0x10] sm:$0xff]  }
  0x44   :  { %667 = vmatprep.subr.bf16.mxu0 %v923_v0  ;;  %687 = vmatprep.subr.bf16.mxu1 %v923_v0  ;;  %v590_v23 = vld [vmem:[%s1065_s2] ss:$0 sm:$0xff]  ;;  %v778_v34 = vld [vmem:[#allocation8 + $0x8] sm:$0xff]   ;;  %v779_v35 = vld [vmem:[#allocation8] sm:$0xff]  }
  0x45   :  { %v780_v36 = vld [vmem:[#allocation10 + $0x38] sm:$0xff]   ;;  %v781_v37 = vld [vmem:[#allocation10 + $0x30] sm:$0xff]   ;;  %v782_v38 = vld [vmem:[#allocation10 + $0x28] sm:$0xff]  }
  0x46   :  { %v783_v39 = vld [vmem:[#allocation10 + $0x20] sm:$0xff]   ;;  %v784_v40 = vld [vmem:[#allocation10 + $0x18] sm:$0xff]   ;;  %v785_v51 = vld [vmem:[#allocation10 + $0x10] sm:$0xff]  }
  0x47   :  { %668 = vmatpush3.bf16.msra.mxu0 %v757_v3  ;;  %688 = vmatpush3.bf16.msra.mxu1 %v766_v8  ;;  %v600_v41 = vld [vmem:[%s1067_s4] ss:$0 sm:$0xff]  ;;  %v786_v52 = vld [vmem:[#allocation10 + $0x8] sm:$0xff]   ;;  %v787_v53 = vld [vmem:[#allocation10] sm:$0xff]  }
  0x48   :  { %669 = vmatprep.subr.bf16.mxu0 %v923_v0  ;;  %689 = vmatprep.subr.bf16.mxu1 %v923_v0  ;;  %v609_v54 = vld [vmem:[%s1069_s6] ss:$0 sm:$0xff]  ;;  %s576_s6 = sshll.u32 %s925_s16, 4  ;;  %s577_s6 = int_to_ptr.vmem [resolvable:$true] %s576_s6 }
  0x49   :  { %s888_s17 = scalar_lea.vmem %s577_s6, 256  ;;  %p893_p12 = scmp.lt.s32.totalorder %s577_s6, %s577_s6 }
  0x4a   :  { %p889_p11 = scmp.ne.s32.totalorder %s577_s6, %s888_s17  ;;  %p894_p13 = scmp.lt.s32.totalorder %s888_s17, %s888_s17 }
  0x4b   :  { %670 = vmatpush3.bf16.msra.mxu0 %v758_v5  ;;  %690 = vmatpush3.bf16.msra.mxu1 %v767_v10 }
  0x4c   :  { %671 = vmatprep.subr.bf16.mxu0 %v923_v0  ;;  %691 = vmatprep.subr.bf16.mxu1 %v923_v0  ;;  %p895_p0 = por %p894_p13, %p893_p12 }
  0x4e   :  { %p896_p1 = pnand %p895_p0, %p889_p11 }
  0x4f   :  { %672 = vmatpush3.bf16.msra.mxu0 %v759_v7  ;;  %692 = vmatpush3.bf16.msra.mxu1 %v768_v12 }
  0x50   :  { %673 = vmatprep.subr.bf16.mxu0 %v923_v0  ;;  %693 = vmatprep.subr.bf16.mxu1 %v923_v0 }
  0x53   :  { %674 = vmatpush3.bf16.msra.mxu0 %v760_v9  ;;  %694 = vmatpush3.bf16.msra.mxu1 %v769_v15 }
  0x54   :  { %675 = vmatprep.subr.bf16.mxu0 %v923_v0  ;;  %695 = vmatprep.subr.bf16.mxu1 %v923_v0 }
  0x57   :  { %676 = vmatpush3.bf16.msra.mxu0 %v761_v11  ;;  %696 = vmatpush3.bf16.msra.mxu1 %v770_v16 }
  0x58   :  { %677 = vmatprep.subr.bf16.mxu0 %v923_v0  ;;  %697 = vmatprep.subr.bf16.mxu1 %v923_v0 }
  0x5b   :  { %678 = vmatpush3.bf16.msra.mxu0 %v762_v13  ;;  %698 = vmatpush3.bf16.msra.mxu1 %v771_v17 }
  0x5c   :  { %703 = vmatprep.subr.bf16.mxu0 %v923_v0  ;;  %723 = vmatprep.subr.bf16.mxu1 %v923_v0 }
  0x5e   :  { %680 = vmatmul.mubr.bf16.vlgmr.msra.gmra.mxu0 %v763_v14 }
  0x5f   :  { %719 = vmatprep.mubr.msk.bf16.mxu0 %vm924_vm0, %v923_v0  ;;  %704 = vmatpush3.bf16.msra.mxu0 %v772_v18 }
  0x60   :  { %705 = vmatprep.subr.bf16.mxu0 %v923_v0 }
  0x63   :  { %706 = vmatpush3.bf16.msra.mxu0 %v773_v19 }
  0x64   :  { %707 = vmatprep.subr.bf16.mxu0 %v923_v0 }
  0x67   :  { %708 = vmatpush3.bf16.msra.mxu0 %v774_v20 }
  0x68   :  { %709 = vmatprep.subr.bf16.mxu0 %v923_v0 }
  0x6b   :  { %710 = vmatpush3.bf16.msra.mxu0 %v775_v21 }
  0x6c   :  { %711 = vmatprep.subr.bf16.mxu0 %v923_v0 }
  0x6f   :  { %712 = vmatpush3.bf16.msra.mxu0 %v776_v22 }
  0x70   :  { %713 = vmatprep.subr.bf16.mxu0 %v923_v0 }
  0x73   :  { %714 = vmatpush3.bf16.msra.mxu0 %v777_v33 }
  0x74   :  { %715 = vmatprep.subr.bf16.mxu0 %v923_v0 }
  0x77   :  { %716 = vmatpush3.bf16.msra.mxu0 %v778_v34 }
  0x78   :  { %717 = vmatprep.subr.bf16.mxu0 %v923_v0 }
  0x7b   :  { %718 = vmatpush3.bf16.msra.mxu0 %v779_v35 }
 0x11e   :  { %v215_v24 = vpop.f32.mrf.mxu0 }
 0x11f   :  { %v216_v26 = vadd.f32 %v590_v23, %v215_v24 }
 0x120   :  { %v681_v25 = vpop.f32.mrf.mxu0 }
 0x121   :  { %v222_v30 = vmax.f32 %v216_v26, 0.0 }
 0x122   :  { %v218_v27 = vpop.f32.mrf.mxu0 }
 0x123   :  { %v219_v28 = vadd.f32 %v590_v23, %v218_v27 }
 0x124   :  { %v682_v29 = vpop.f32.mrf.mxu0 }
 0x125   :  { %v223_v31 = vmax.f32 %v219_v28, 0.0 }
 0x127   :  { %v224_v32 = vpack.c.bf16 %v223_v31, %v222_v30 }
 0x129   :  { %700 = vmatmul.mubr.bf16.vlgmr.msra.gmra.mxu1 %v224_v32 }
 0x12a   :  { %739 = vmatprep.mubr.msk.bf16.mxu1 %vm924_vm0, %v923_v0  ;;  %724 = vmatpush3.bf16.msra.mxu1 %v780_v36 }
 0x12b   :  { %725 = vmatprep.subr.bf16.mxu1 %v923_v0 }
 0x12e   :  { %726 = vmatpush3.bf16.msra.mxu1 %v781_v37 }
 0x12f   :  { %727 = vmatprep.subr.bf16.mxu1 %v923_v0 }
 0x132   :  { %728 = vmatpush3.bf16.msra.mxu1 %v782_v38 }
 0x133   :  { %729 = vmatprep.subr.bf16.mxu1 %v923_v0 }
 0x136   :  { %730 = vmatpush3.bf16.msra.mxu1 %v783_v39 }
 0x137   :  { %731 = vmatprep.subr.bf16.mxu1 %v923_v0 }
 0x13a   :  { %732 = vmatpush3.bf16.msra.mxu1 %v784_v40 }
 0x13b   :  { %733 = vmatprep.subr.bf16.mxu1 %v923_v0 }
 0x13e   :  { %734 = vmatpush3.bf16.msra.mxu1 %v785_v51 }
 0x13f   :  { %735 = vmatprep.subr.bf16.mxu1 %v923_v0 }
 0x142   :  { %736 = vmatpush3.bf16.msra.mxu1 %v786_v52 }
 0x143   :  { %737 = vmatprep.subr.bf16.mxu1 %v923_v0  ;;  %v618_v0 = vld [vmem:[%s1071_s8] ss:$0 sm:$0xff] }
 0x146   :  { %738 = vmatpush3.bf16.msra.mxu1 %v787_v53 }
 0x1e9   :  { %v330_v42 = vpop.f32.mrf.mxu1 }
 0x1ea   :  { %v331_v44 = vadd.f32 %v600_v41, %v330_v42 }
 0x1eb   :  { %v701_v43 = vpop.f32.mrf.mxu1 }
 0x1ec   :  { %v337_v48 = vmax.f32 %v331_v44, 0.0 }
 0x1ed   :  { %v333_v45 = vpop.f32.mrf.mxu1 }
 0x1ee   :  { %v334_v46 = vadd.f32 %v600_v41, %v333_v45 }
 0x1ef   :  { %v702_v47 = vpop.f32.mrf.mxu1 }
 0x1f0   :  { %v338_v49 = vmax.f32 %v334_v46, 0.0 }
 0x1f2   :  { %v339_v50 = vpack.c.bf16 %v338_v49, %v337_v48 }
 0x1f4   :  { %720 = vmatmul.mubr.bf16.vlgmr.msra.gmra.mxu0 %v339_v50 }
 0x2b4   :  { %v445_v55 = vpop.f32.mrf.mxu0 }
 0x2b5   :  { %v446_v57 = vadd.f32 %v609_v54, %v445_v55 }
 0x2b6   :  { %v721_v56 = vpop.f32.mrf.mxu0 }
 0x2b7   :  { %v452_v61 = vmax.f32 %v446_v57, 0.0 }
 0x2b8   :  { %v448_v58 = vpop.f32.mrf.mxu0 }
 0x2b9   :  { %v449_v59 = vadd.f32 %v609_v54, %v448_v58 }
 0x2ba   :  { %v722_v60 = vpop.f32.mrf.mxu0 }
 0x2bb   :  { %v453_v62 = vmax.f32 %v449_v59, 0.0 }
 0x2bd   :  { %v454_v63 = vpack.c.bf16 %v453_v62, %v452_v61 }
 0x2bf   :  { %740 = vmatmul.mubr.bf16.vlgmr.msra.gmra.mxu1 %v454_v63 }
 0x37f   :  { %v560_v1 = vpop.f32.mrf.mxu1 }
 0x380   :  { %v561_v2 = vadd.f32 %v618_v0, %v560_v1 }
 0x381   :  { %v741_v3 = vpop.f32.mrf.mxu1 }
 0x382   :  { %v567_v4 = vmax.f32 %v561_v2, 0.0 }
 0x383   :  { %v563_v5 = vpop.f32.mrf.mxu1 }
 0x384   :  { %569 = vst [vmem:[#allocation11] sm:$0xff] %v567_v4  ;;  %v564_v6 = vadd.f32 %v618_v0, %v563_v5 }
 0x385   :  { %v742_v7 = vpop.f32.mrf.mxu1 }
 0x386   :  { %v568_v8 = vmax.f32 %v564_v6, 0.0 }
 0x388   :  { %570 = vst [vmem:[#allocation11 + $0x8] sm:$0xff] %v568_v8 }
 0x389   :  { %899 = shalt.err (!%p896_p1)
}
 0x38a   :  { %s926_s8 = smov 128   ;;  %s927_s18 = smov 8  }
 0x38b   :  { %582 = dma.vmem_to_hbm [thread:$0]  %s577_s6, 256, %s1072_s9, [#allocation4], %s926_s8, %s926_s8, %s927_s18  }
 0x38c   :  { %914 = dma.done.wait [#allocation4], 256  }
 0x38d   :  { %915 = vsyncadd [#allocation4], 4294967040 }
 0x38e   :  { %586 = vsyncpa [#allocation3], 1 }
 0x38f   :  { %587 = vsyncpa [#allocation6], 1 }
 0x390   :  { %588 = vsyncpa [#allocation9], 1 }
 0x391   :  { %589 = vsyncpa [#allocation4], 1 }

</bundles_post_ra>
